<compile_context>
chip_gen: v5e
topology: v5e:2x2
jax: 0.10.0
libtpu: 0.0.40
codegen_flags: <defaults>
</compile_context>

<pallas_src>
import functools
import math

import jax
import jax.numpy as jnp
from jax.experimental import pallas as pl
from jax.experimental.pallas import tpu as pltpu


_MAX_BT_UNROLL = 32   # kernel statically unrolls over the batch-tile dimension


def _cdiv(a, b):
    return -(-a // b)


def _vmem_budget():
    """Per-generation (field-block target bytes, vmem_limit_bytes).

    Total VMEM footprint is ~9x the block target (2x theta + 2x field-in +
    2x field-out double buffers + 3x coefficient scratch), so:
      v5e/v6e (128 MiB VMEM): 6 MiB blocks -> ~54 MiB, limit 64 MiB.
      v7x     ( 64 MiB VMEM): 3 MiB blocks -> ~27 MiB, limit 48 MiB.
    """
    try:
        cap = pltpu.get_tpu_info().vmem_capacity_bytes
    except Exception:
        cap = None
    if cap is not None and cap >= 100 * 1024 * 1024:
        return 6 << 20, 64 << 20          # v5e / v6e
    return 3 << 20, 48 << 20              # v7x / unknown (conservative)


def _plan_tiles(bs, C, L, target_bytes, itemsize=4):
    """Pick (ct, n_ct, bt, n_bt, n_split) for grid (n_split, n_ct, n_bt//n_split)."""
    lane_bytes = L * itemsize

    # Channel tile: the full channel dim when it fits (always layout-legal),
    # otherwise the largest multiple of 8 whose single-batch slab fits budget
    # (ragged last block handled by cdiv).
    if C <= 8 or C * lane_bytes <= target_bytes:
        ct = C
    else:
        ct = max(8, (target_bytes // lane_bytes) // 8 * 8)
    n_ct = _cdiv(C, ct)

    # Batch tile: fill the block budget (bounded by bs and the unroll cap).
    per_batch = ct * lane_bytes
    bt = int(max(1, min(bs, _MAX_BT_UNROLL, target_bytes // per_batch)))
    n_bt = _cdiv(bs, bt)

    # v7x megacore: if the channel axis collapsed to a single tile, expose a
    # 2-wide parallel split of the batch blocks so both TensorCores get work.
    n_split = 1
    if n_ct == 1 and bs >= 2:
        if n_bt < 2 or n_bt % 2:
            for cand in range(bt, 0, -1):          # prefer an even block count
                nb = _cdiv(bs, cand)
                if nb >= 2 and nb % 2 == 0:
                    bt, n_bt = cand, nb
                    break
        if n_bt >= 2 and n_bt % 2 == 0:
            n_split = 2

    return ct, n_ct, bt, n_bt, n_split


def _phase_mod_kernel(theta_ref, x_ref, o_ref, cos_ref, nxt_ref, prv_ref):
    # theta_ref: (ct, L) phase repeated per (re, im) lane pair; resident across
    #            the inner batch sweep.
    # x_ref/o_ref: (bt, ct, L) interleaved re/im f32 field blocks.
    # cos/nxt/prv: (ct, L) VMEM scratch coefficient planes.

    # Hoisted transcendentals: recompute coefficients only at the start of each
    # inner batch sweep, i.e. at most once per (split, channel-tile) pair.
    @pl.when(pl.program_id(2) == 0)
    def _():
        theta = (2.0 * math.pi) * theta_ref[...]
        c = jnp.cos(theta)
        s = jnp.sin(theta)
        lane = jax.lax.broadcasted_iota(jnp.int32, theta.shape, 1)
        is_re = (lane % 2) == 0                    # even lanes hold real parts
        cos_ref[...] = c
        nxt_ref[...] = jnp.where(is_re, -s, 0.0)   # pairs with x[i+1]
        prv_ref[...] = jnp.where(is_re, 0.0, s)    # pairs with x[i-1]

    cosv = cos_ref[...]
    nxtv = nxt_ref[...]
    prvv = prv_ref[...]

    bt = x_ref.shape[0]
    L = x_ref.shape[-1]
    for i in range(bt):                            # static unroll, bt <= 32
        x = x_ref[i]                               # (ct, L)
        x_next = pltpu.roll(x, L - 1, 1)           # x_next[j] = x[(j+1) % L]
        x_prev = pltpu.roll(x, 1, 1)               # x_prev[j] = x[(j-1) % L]
        o_ref[i] = x * cosv + x_next * nxtv + x_prev * prvv


def _phase_modulation_ri_impl(x_ri, phase_values, M, donate):
    bs, oc, ic, Mx, My, two = x_ri.shape
    assert Mx == M and My == M and two == 2
    N = phase_values.shape[-1]
    start = (M - N) // 2
    C = oc * ic
    L = 2 * M * M
    # TODO(synk): for M not a multiple of 8 (L not a multiple of 128) fold/pad
    # the trailing dims to stay lane-dense; correctness is unaffected (L is the
    # full last dim), only store efficiency.

    # Glue on the (small) phase tensor: centre-pad, flatten, repeat per (re, im).
    padded = jnp.pad(
        phase_values.astype(jnp.float32),
        ((0, 0), (0, 0), (start, M - N - start), (start, M - N - start)),
    ).reshape(C, M * M)
    theta_rep = jnp.broadcast_to(padded[:, :, None], (C, M * M, 2)).reshape(C, L)

    # Lane-dense view of the field (free reshape under jit).
    x_flat = x_ri.reshape(bs, C, L)

    target_bytes, vmem_limit = _vmem_budget()
    ct, n_ct, bt, n_bt, n_split = _plan_tiles(bs, C, L, target_bytes)
    n_bt_inner = n_bt // n_split
    grid = (n_split, n_ct, n_bt_inner)

    def theta_map(s, c, b):
        return (c, 0)

    def field_map(s, c, b):
        return (s * n_bt_inner + b, c, 0)

    out_flat = pl.pallas_call(
        _phase_mod_kernel,
        out_shape=jax.ShapeDtypeStruct((bs, C, L), jnp.float32),
        grid_spec=pltpu.PrefetchScalarGridSpec(
            num_scalar_prefetch=0,
            grid=grid,
            in_specs=[
                pl.BlockSpec((ct, L), theta_map),       # phase: resident over b
                pl.BlockSpec((bt, ct, L), field_map),   # field
            ],
            out_specs=pl.BlockSpec((bt, ct, L), field_map),
            scratch_shapes=[
                pltpu.VMEM((ct, L), jnp.float32),   # cos
                pltpu.VMEM((ct, L), jnp.float32),   # -sin on even lanes
                pltpu.VMEM((ct, L), jnp.float32),   # +sin on odd lanes
            ],
        ),
        compiler_params=pltpu.CompilerParams(
            dimension_semantics=("parallel", "parallel", "arbitrary"),
            vmem_limit_bytes=vmem_limit,
        ),
        cost_estimate=pl.CostEstimate(
            flops=5 * bs * C * L,
            transcendentals=2 * C * L,
            bytes_accessed=2 * bs * C * L * 4 + C * L * 4,
        ),
        input_output_aliases=({1: 0} if donate else {}),
    )(theta_rep, x_flat)

    return out_flat.reshape(bs, oc, ic, M, M, 2)


@functools.partial(jax.jit, static_argnums=(2,))
def phase_modulation_forward_ri(x_ri, phase_values, M):
    """Fast path.

    x_ri:         float32 (bs, oc, ic, M, M, 2) interleaved (re, im) — the exact
                  memory layout of a complex64 tensor.
    phase_values: float32 (oc, ic, N, N).
    returns:      float32 (bs, oc, ic, M, M, 2) = x * exp(i*2*pi*padded_phase).
    """
    return _phase_modulation_ri_impl(x_ri, phase_values, M, donate=False)


@functools.partial(jax.jit, static_argnums=(2,), donate_argnums=(0,))
def phase_modulation_forward_ri_donated(x_ri, phase_values, M):
    """Same as phase_modulation_forward_ri but donates the field buffer and
    aliases it to the output (saves the output HBM allocation)."""
    return _phase_modulation_ri_impl(x_ri, phase_values, M, donate=True)


def phase_modulation_forward(x_complex, phase_values, M):
    """complex64 convenience wrapper (API parity with the PyTorch module).
    complex64 cannot be bitcast in JAX, so this path pays one split/recombine;
    prefer phase_modulation_forward_ri with the interleaved f32 layout."""
    x_ri = jnp.stack(
        [jnp.real(x_complex), jnp.imag(x_complex)], axis=-1
    ).astype(jnp.float32)
    out_ri = phase_modulation_forward_ri(x_ri, phase_values, M)
    return (out_ri[..., 0] + 1j * out_ri[..., 1]).astype(jnp.complex64)


def reference_forward(x_complex, phase_values, M):
    """Pure-JAX reference mirroring the PyTorch forward exactly."""
    N = phase_values.shape[-1]
    start = (M - N) // 2
    padded = jnp.pad(
        phase_values,
        ((0, 0), (0, 0), (start, M - N - start), (start, M - N - start)),
    )
    mod = jnp.exp(1j * 2.0 * jnp.pi * padded.astype(jnp.complex64))
    return x_complex * mod[None]


if __name__ == "__main__":
    bs, out_channels, in_channels, M, N = 2, 4, 2, 16, 8

    key = jax.random.PRNGKey(0)
    k_phase, k_x = jax.random.split(key)

    # nn.init.uniform_(phase_values, a=0, b=2), shape (oc, ic, N, N)
    phase_values = jax.random.uniform(
        k_phase, (out_channels, in_channels, N, N),
        minval=0.0, maxval=2.0, dtype=jnp.float32)

    # Interleaved (re, im) float32 field — bit-identical layout to complex64.
    x_ri = jax.random.normal(
        k_x, (bs, out_channels, in_channels, M, M, 2), jnp.float32)
    x_complex = (x_ri[..., 0] + 1j * x_ri[..., 1]).astype(jnp.complex64)

    out_ri = jax.block_until_ready(
        phase_modulation_forward_ri(x_ri, phase_values, M))

    ref = reference_forward(x_complex, phase_values, M)
    out_c = (out_ri[..., 0] + 1j * out_ri[..., 1]).astype(jnp.complex64)
    assert out_ri.shape == (bs, out_channels, in_channels, M, M, 2)
    assert jnp.allclose(out_c, ref, atol=1e-5, rtol=1e-5)

    # Also exercise the complex64 convenience wrapper.
    out_complex = jax.block_until_ready(
        phase_modulation_forward(x_complex, phase_values, M))
    assert out_complex.dtype == jnp.complex64
    assert jnp.allclose(out_complex, ref, atol=1e-5, rtol=1e-5)

    print("KERNEL_OK")
</pallas_src>

<mosaic_0001>
module attributes {stable_mosaic.version = 11 : i64} {
  func.func @_phase_mod_kernel(%arg0: i32, %arg1: i32, %arg2: i32, %arg3: memref<8x512xf32, #tpu.memory_space<vmem>>, %arg4: memref<1x8x512xf32, #tpu.memory_space<vmem>>, %arg5: memref<1x8x512xf32, #tpu.memory_space<vmem>>, %arg6: memref<8x512xf32, #tpu.memory_space<vmem>>, %arg7: memref<8x512xf32, #tpu.memory_space<vmem>>, %arg8: memref<8x512xf32, #tpu.memory_space<vmem>>) attributes {dimension_semantics = [#tpu.dimension_semantics<parallel>, #tpu.dimension_semantics<parallel>, #tpu.dimension_semantics<arbitrary>], iteration_bounds = array<i64: 2, 1, 1>, scalar_prefetch = 0 : i64, scratch_operands = 3 : i64, tpu.core_type = #tpu.core_type<tc>, window_params = [{transform_indices = @transform_0, window_bounds = array<i64: 8, 512>}, {transform_indices = @transform_1, window_bounds = array<i64: 1, 8, 512>}, {transform_indices = @transform_2, window_bounds = array<i64: 1, 8, 512>}]} {
    %c0_i32 = arith.constant 0 : i32
    %0 = arith.cmpi eq, %arg2, %c0_i32 : i32
    %1 = arith.extui %0 : i1 to i32
    %c0_i32_0 = arith.constant 0 : i32
    %2 = arith.cmpi ne, %1, %c0_i32_0 : i32
    scf.if %2 {
      %c0_12 = arith.constant 0 : index
      %c0_13 = arith.constant 0 : index
      %18 = vector.load %arg3[%c0_12, %c0_13] : memref<8x512xf32, #tpu.memory_space<vmem>>, vector<8x512xf32>
      %cst = arith.constant 6.28318548 : f32
      %19 = vector.broadcast %cst : f32 to vector<8x512xf32>
      %20 = arith.mulf %19, %18 : vector<8x512xf32>
      %21 = math.cos %20 : vector<8x512xf32>
      %22 = math.sin %20 : vector<8x512xf32>
      %23 = tpu.iota {dimensions = array<i32: 1>} : vector<8x512xi32>
      %c2_i32 = arith.constant 2 : i32
      %c0_i32_14 = arith.constant 0 : i32
      %24 = arith.cmpi eq, %c2_i32, %c0_i32_14 : i32
      %c1_i32_15 = arith.constant 1 : i32
      %25 = arith.select %24, %c1_i32_15, %c2_i32 : i32
      %26 = vector.broadcast %25 : i32 to vector<8x512xi32>
      %27 = arith.remsi %23, %26 : vector<8x512xi32>
      %c0_i32_16 = arith.constant 0 : i32
      %28 = vector.broadcast %c0_i32_16 : i32 to vector<8x512xi32>
      %29 = arith.cmpi ne, %27, %28 : vector<8x512xi32>
      %c0_i32_17 = arith.constant 0 : i32
      %30 = vector.broadcast %c0_i32_17 : i32 to vector<8x512xi32>
      %31 = arith.cmpi slt, %27, %30 : vector<8x512xi32>
      %c0_i32_18 = arith.constant 0 : i32
      %32 = arith.cmpi slt, %25, %c0_i32_18 : i32
      %33 = vector.broadcast %32 : i1 to vector<8x512xi1>
      %34 = vector.broadcast %33 : vector<8x512xi1> to vector<8x512xi1>
      %35 = arith.xori %31, %34 : vector<8x512xi1>
      %36 = arith.andi %35, %29 : vector<8x512xi1>
      %37 = vector.broadcast %25 : i32 to vector<8x512xi32>
      %38 = arith.addi %27, %37 : vector<8x512xi32>
      %39 = arith.select %36, %38, %27 : vector<8x512xi1>, vector<8x512xi32>
      %c0_i32_19 = arith.constant 0 : i32
      %40 = vector.broadcast %c0_i32_19 : i32 to vector<8x512xi32>
      %41 = arith.cmpi eq, %39, %40 : vector<8x512xi32>
      %c0_20 = arith.constant 0 : index
      %c0_21 = arith.constant 0 : index
      %42 = vector.load %arg6[%c0_20, %c0_21] : memref<8x512xf32, #tpu.memory_space<vmem>>, vector<8x512xf32>
      tpu.vector_store %arg6[%c0_20, %c0_21], %21 {strides = array<i32>} : memref<8x512xf32, #tpu.memory_space<vmem>>, vector<8x512xf32>,
      %cst_22 = arith.constant 0.000000e+00 : f32
      %43 = vector.broadcast %cst_22 : f32 to vector<8x512xf32>
      %44 = arith.subf %43, %22 : vector<8x512xf32>
      %cst_23 = arith.constant 0.000000e+00 : f32
      %45 = vector.broadcast %cst_23 : f32 to vector<8x512xf32>
      %46 = arith.select %41, %44, %45 : vector<8x512xi1>, vector<8x512xf32>
      %c0_24 = arith.constant 0 : index
      %c0_25 = arith.constant 0 : index
      %47 = vector.load %arg7[%c0_24, %c0_25] : memref<8x512xf32, #tpu.memory_space<vmem>>, vector<8x512xf32>
      tpu.vector_store %arg7[%c0_24, %c0_25], %46 {strides = array<i32>} : memref<8x512xf32, #tpu.memory_space<vmem>>, vector<8x512xf32>,
      %cst_26 = arith.constant 0.000000e+00 : f32
      %48 = vector.broadcast %cst_26 : f32 to vector<8x512xf32>
      %49 = arith.select %41, %48, %22 : vector<8x512xi1>, vector<8x512xf32>
      %c0_27 = arith.constant 0 : index
      %c0_28 = arith.constant 0 : index
      %50 = vector.load %arg8[%c0_27, %c0_28] : memref<8x512xf32, #tpu.memory_space<vmem>>, vector<8x512xf32>
      tpu.vector_store %arg8[%c0_27, %c0_28], %49 {strides = array<i32>} : memref<8x512xf32, #tpu.memory_space<vmem>>, vector<8x512xf32>,
    } else {
    }
    %c0 = arith.constant 0 : index
    %c0_1 = arith.constant 0 : index
    %3 = vector.load %arg6[%c0, %c0_1] : memref<8x512xf32, #tpu.memory_space<vmem>>, vector<8x512xf32>
    %c0_2 = arith.constant 0 : index
    %c0_3 = arith.constant 0 : index
    %4 = vector.load %arg7[%c0_2, %c0_3] : memref<8x512xf32, #tpu.memory_space<vmem>>, vector<8x512xf32>
    %c0_4 = arith.constant 0 : index
    %c0_5 = arith.constant 0 : index
    %5 = vector.load %arg8[%c0_4, %c0_5] : memref<8x512xf32, #tpu.memory_space<vmem>>, vector<8x512xf32>
    %c0_6 = arith.constant 0 : index
    %c0_7 = arith.constant 0 : index
    %c0_8 = arith.constant 0 : index
    %6 = vector.load %arg4[%c0_6, %c0_7, %c0_8] : memref<1x8x512xf32, #tpu.memory_space<vmem>>, vector<1x8x512xf32>
    %7 = vector.shape_cast %6 : vector<1x8x512xf32> to vector<8x512xf32>
    %c511_i32 = arith.constant 511 : i32
    %8 = tpu.dynamic_rotate %7 by %c511_i32 dim 1 : vector<8x512xf32>, i32 -> vector<8x512xf32>
    %c1_i32 = arith.constant 1 : i32
    %9 = tpu.dynamic_rotate %7 by %c1_i32 dim 1 : vector<8x512xf32>, i32 -> vector<8x512xf32>
    %10 = arith.mulf %7, %3 : vector<8x512xf32>
    %11 = arith.mulf %8, %4 : vector<8x512xf32>
    %12 = arith.addf %10, %11 : vector<8x512xf32>
    %13 = arith.mulf %9, %5 : vector<8x512xf32>
    %14 = arith.addf %12, %13 : vector<8x512xf32>
    %c0_9 = arith.constant 0 : index
    %c0_10 = arith.constant 0 : index
    %c0_11 = arith.constant 0 : index
    %15 = vector.load %arg5[%c0_9, %c0_10, %c0_11] : memref<1x8x512xf32, #tpu.memory_space<vmem>>, vector<1x8x512xf32>
    %16 = vector.shape_cast %15 : vector<1x8x512xf32> to vector<8x512xf32>
    %17 = vector.shape_cast %14 : vector<8x512xf32> to vector<1x8x512xf32>
    tpu.vector_store %arg5[%c0_9, %c0_10, %c0_11], %17 {strides = array<i32>} : memref<1x8x512xf32, #tpu.memory_space<vmem>>, vector<1x8x512xf32>,
    return
  }
  func.func @transform_0(%arg0: i32, %arg1: i32, %arg2: i32) -> (i32, i32) {
    %c0_i32 = arith.constant 0 : i32
    %c0_i32_0 = arith.constant 0 : i32
    return %arg1, %c0_i32 : i32, i32
  }
  func.func @transform_1(%arg0: i32, %arg1: i32, %arg2: i32) -> (i32, i32, i32) {
    %c1_i32 = arith.constant 1 : i32
    %0 = arith.muli %arg0, %c1_i32 : i32
    %1 = arith.addi %0, %arg2 : i32
    %c0_i32 = arith.constant 0 : i32
    %c0_i32_0 = arith.constant 0 : i32
    return %1, %arg1, %c0_i32 : i32, i32, i32
  }
  func.func @transform_2(%arg0: i32, %arg1: i32, %arg2: i32) -> (i32, i32, i32) {
    %c1_i32 = arith.constant 1 : i32
    %0 = arith.muli %arg0, %c1_i32 : i32
    %1 = arith.addi %0, %arg2 : i32
    %c0_i32 = arith.constant 0 : i32
    %c0_i32_0 = arith.constant 0 : i32
    return %1, %arg1, %c0_i32 : i32, i32, i32
  }
}

</mosaic_0001>

<bundles_post_ra>
// kernel: phase_modulation_forward_ri.1
= control target key start
LH: loop header
LB: loop body
LE: loop exit
PB: predicated region body
PF: predicated region fallthrough
CT: control target
= control target key end

     0   :  { %s1852_s9 = smov 0   ;;  %s1854_s10 = smov 0   ;;  %s2508_s0 = inlined_call_operand.vmem [shape: f32[8,512], index: 0, kind: input, shape index: {}]   ;;  %s2509_s1 = inlined_call_operand.vmem [shape: f32[2,8,512], index: 1, kind: input, shape index: {}]   ;;  %s2510_s2 = inlined_call_operand.vmem [shape: f32[2,8,512], index: 2, kind: output, shape index: {}]  }
   0x1   :  { %s1856_s11 = smov 0  }
   0x2 LB: > { %s31_s12 = sadd.s32 1, %s1822_s10  ;;  %p1735_p0 = scmp.ge.s32.totalorder %s1826_s11, 1  ;;  %s1826_s11 = sphi %s1856_s11, %s12_s11   ;;  %s1822_s10 = sphi %s1854_s10, %s2526_s10   ;;  %s1818_s9 = sphi %s1852_s9, %s2525_s9  }
   0x3   : > { %p33_p1 = scmp.ge.s32.totalorder %s31_s12, 2  ;;  %p155_p2 = scmp.lt.s32.totalorder %s1826_s11, 3 }
   0x5   : > { %s2528_s12 = smov (%p33_p1, %s31_s12), 0  ;;  %p156_p3 = pnand %p1735_p0, %p155_p2 }
   0x6   : > { %p198_p4 = scmp.lt.s32.totalorder (!%p156_p3), %s1818_s9, 1  ;;  %s1828_s23 = smov (!%p156_p3), 127  }
   0x7   : > { %159 = sbr.rel (%p156_p3) target bundleno = 208 (0xd0), region = 28  ;;  %s1829_s24 = smov (!%p156_p3), 1  }
   0xc   : > { %v225_v0 = vld [vmem:[%s2508_s0 + $0x10] sm:$0xff]  ;;  %s2530_s9 = smov (!%p198_p4, %s1818_s9), 1  ;;  %v223_v4 = vld [vmem:[%s2508_s0] sm:$0xff]  ;;  %v226_v6 = vld [vmem:[%s2508_s0 + $0x18] sm:$0xff]  ;;  %v1830_v27 = vmov 683565275  }
   0xd   : > { %v1873_v1 = vmul.f32 6.2831855, %v225_v0  ;;  %s1766_s17 = sshll.u32 %s2530_s9, 5  ;;  %v1883_v5 = vmul.f32 6.2831855, %v223_v4 }
   0xe   : > { %s1893_s22 = scalar_lea.vmem %s2509_s1, %s1766_s17  ;;  %v1902_v12 = vmul.f32 6.2831855, %v226_v6  ;;  %v1831_v29 = vmov 2475754826   ;;  %v1832_v31 = vmov 2131351028   ;;  %s2483_s29 = scalar_lea.vmem %s2510_s2, %s1766_s17 }
   0xf   : > { %v539_v2 = vand.u32 2147483647, %v1873_v1  ;;  %v542_v3 = vand.u32 2139095040, %v1873_v1  ;;  %v1898_v9 = vld [vmem:[%s1893_s22 + $0x10] sm:$0xff]  ;;  %v234_v10 = vand.u32 2139095040, %v1883_v5  ;;  %v1560_v11 = vld [vmem:[%s1893_s22] sm:$0xff] }
  0x10   : > { %1568 = vrot.lane.b32.xlu1 %v1898_v9, %s1828_s23  ;;  %1564 = vrot.lane.b32.xlu0 %v1560_v11, %s1828_s23  ;;  %v696_v19 = vand.u32 2139095040, %v1902_v12  ;;  %v1833_v33 = vmov 2102212464   ;;  %v1834_v35 = vmov 920167782   ;;  %v1563_v38 = vld [vmem:[%s1893_s22 + $0x18] sm:$0xff] }
  0x11   : > { %v543_v7 = vshrl.u32 %v542_v3, 23  ;;  %v546_v8 = vand.u32 8388607, %v539_v2  ;;  %v235_v15 = vshrl.u32 %v234_v10, 23  ;;  %1579 = vrot.lane.b32.xlu2 %v1560_v11, %s1829_s24  ;;  %v231_v37 = vand.u32 2147483647, %v1883_v5 }
  0x12   : > { %v697_v25 = vshrl.u32 %v696_v19, 23  ;;  %v1835_v44 = vmov 1326507024  }
  0x13   : > { %v1746_v13 = vadd.s32 4294967169, %v543_v7  ;;  %v547_v14 = vor.u32 8388608, %v546_v8  ;;  %v1740_v18 = vadd.s32 4294967169, %v235_v15  ;;  %v1936_v51 = vand.u32 8388607, %v231_v37 }
  0x14   : > { %v1944_v59 = vadd.s32 4294967169, %v697_v25 }
  0x15   : > { %v549_v16 = vadd.s32 1, %v1746_v13  ;;  %v1908_v17 = vshll.u32 %v547_v14, 8  ;;  %v241_v21 = vadd.s32 1, %v1740_v18  ;;  %v239_v4 = vor.u32 8388608, %v1936_v51 }
  0x17   : > { %vm550_vm0 = vcmp.gt.s32.totalorder %v549_v16, 0  ;;  %v1914_v24 = vand.u32 65535, %v1908_v17  ;;  %vm242_vm1 = vcmp.gt.s32.totalorder %v241_v21, 0  ;;  %v589_v58 = vshrl.u32 %v1908_v17, 16 }
  0x18   : > { %v551_v20 = vsel %vm550_vm0, %v549_v16, 0  ;;  %1570 = vrot.lane.b32.xlu1 %v1563_v38, %s1828_s23  ;;  %v243_v55 = vsel %vm242_vm1, %v241_v21, 0 }
  0x19   : > { %v1911_v22 = vshrl.u32 %v551_v20, 5  ;;  %v553_v23 = vand.u32 31, %v551_v20  ;;  %v245_v6 = vand.u32 31, %v243_v55  ;;  %v1956_v13 = vshrl.u32 %v243_v55, 5 }
  0x1b   : > { %v554_v26 = vsub.s32 32, %v553_v23  ;;  %v556_v28 = vshll.u32 %v1830_v27, %v553_v23  ;;  %v559_v30 = vshll.u32 %v1831_v29, %v553_v23  ;;  %v562_v32 = vshll.u32 %v1832_v31, %v553_v23 }
  0x1c   : > { %v565_v34 = vshll.u32 %v1833_v33, %v553_v23  ;;  %v568_v36 = vshll.u32 %v1834_v35, %v553_v23  ;;  %vm571_vm2 = vcmp.lt.s32.totalorder %v1911_v22, 1  ;;  %vm572_vm3 = vcmp.lt.s32.totalorder %v1911_v22, 2 }
  0x1d   : > { %v557_v39 = vshrl.u32 %v1831_v29, %v554_v26  ;;  %v560_v40 = vshrl.u32 %v1832_v31, %v554_v26  ;;  %v563_v41 = vshrl.u32 %v1833_v33, %v554_v26  ;;  %v555_v42 = vshrl.u32 %v1830_v27, %v554_v26 }
  0x1e   : > { %v566_v43 = vshrl.u32 %v1834_v35, %v554_v26  ;;  %v569_v45 = vshrl.u32 %v1835_v44, %v554_v26  ;;  %vm574_vm4 = vcmp.lt.s32.totalorder %v1911_v22, 4  ;;  %vm573_vm5 = vcmp.lt.s32.totalorder %v1911_v22, 3 }
  0x1f   : > { %v558_v46 = vor.u32 %v557_v39, %v556_v28  ;;  %v561_v47 = vor.u32 %v560_v40, %v559_v30  ;;  %v564_v48 = vor.u32 %v563_v41, %v562_v32  ;;  %v1958_v14 = vsub.s32 32, %v245_v6 }
  0x20   : > { %v567_v49 = vor.u32 %v566_v43, %v565_v34  ;;  %v570_v50 = vor.u32 %v569_v45, %v568_v36  ;;  %1585 = vrot.lane.b32.xlu1 %v1563_v38, %s1829_s24  ;;  %v248_v15 = vshll.u32 %v1830_v27, %v245_v6  ;;  %v251_v16 = vshll.u32 %v1831_v29, %v245_v6 }
  0x21   : > { %v576_v52 = vsel %vm574_vm4, %v564_v48, 2102212464  ;;  %v579_v53 = vsel %vm571_vm2, %v558_v46, %v561_v47  ;;  %v583_v54 = vsel %vm571_vm2, %v561_v47, %v564_v48  ;;  %v1948_v60 = vsel %vm571_vm2, %v555_v42, %v558_v46 }
  0x22   : > { %v580_v56 = vsel %vm574_vm4, %v567_v49, 920167782  ;;  %v584_v57 = vsel %vm574_vm4, %v570_v50, 1326507024  ;;  %v577_v61 = vsel %vm573_vm5, %v561_v47, %v576_v52  ;;  %v254_v21 = vshll.u32 %v1832_v31, %v245_v6 }
  0x23   : > { %v581_v62 = vsel %vm573_vm5, %v564_v48, %v580_v56  ;;  %v585_v63 = vsel %vm573_vm5, %v567_v49, %v584_v57  ;;  %v249_v43 = vshrl.u32 %v1831_v29, %v1958_v14  ;;  %v252_v45 = vshrl.u32 %v1832_v31, %v1958_v14 }
  0x24   : > { %v582_v0 = vsel %vm572_vm3, %v579_v53, %v581_v62  ;;  %v586_v3 = vsel %vm572_vm3, %v583_v54, %v585_v63  ;;  %v1836_v46 = vmov 0   ;;  %v255_v48 = vshrl.u32 %v1833_v33, %v1958_v14 }
  0x25   : > { %v590_v7 = vand.u32 65535, %v586_v3  ;;  %v591_v8 = vshrl.u32 %v586_v3, 16  ;;  %v612_v10 = vand.u32 65535, %v582_v0  ;;  %v613_v11 = vshrl.u32 %v582_v0, 16 }
  0x26   : > { %v250_v55 = vor.u32 %v249_v43, %v248_v15  ;;  %v1979_v62 = vor.u32 %v252_v45, %v251_v16  ;;  %v256_v0 = vor.u32 %v255_v48, %v254_v21  ;;  %v257_v3 = vshll.u32 %v1833_v33, %v245_v6 }
  0x27   : > { %v592_v18 = vmul.u32 %v590_v7, %v1914_v24  ;;  %v593_v19 = vmul.u32 %v591_v8, %v1914_v24  ;;  %v594_v20 = vmul.u32 %v590_v7, %v589_v58  ;;  %v595_v23 = vmul.u32 %v591_v8, %v589_v58 }
  0x28   : > { %v614_v25 = vmul.u32 %v612_v10, %v1914_v24  ;;  %v615_v26 = vmul.u32 %v613_v11, %v1914_v24  ;;  %v616_v28 = vmul.u32 %v612_v10, %v589_v58  ;;  %v617_v36 = vmul.u32 %v613_v11, %v589_v58 }
  0x29   : > { %v596_v30 = vshll.u32 %v593_v19, 16  ;;  %v597_v32 = vshrl.u32 %v593_v19, 16  ;;  %v598_v34 = vshll.u32 %v594_v20, 16  ;;  %v599_v38 = vshrl.u32 %v594_v20, 16 }
  0x2a   : > { %v618_v39 = vshll.u32 %v615_v26, 16  ;;  %v619_v40 = vshrl.u32 %v615_v26, 16  ;;  %v620_v41 = vshll.u32 %v616_v28, 16  ;;  %v621_v50 = vshrl.u32 %v616_v28, 16 }
  0x2b   : > { %vm600_vm6 = vc.u32 %v592_v18, %v596_v30  ;;  %v602_v42 = vadd.s32 %v596_v30, %v592_v18  ;;  %v258_v7 = vshrl.u32 %v1834_v35, %v1958_v14  ;;  %v260_v10 = vshll.u32 %v1834_v35, %v245_v6 }
  0x2c   : > { %v601_v24 = vsel %vm600_vm6, 1, %v1836_v46  ;;  %vm622_vm7 = vc.u32 %v614_v25, %v618_v39  ;;  %v624_v47 = vadd.s32 %v618_v39, %v614_v25  ;;  %v261_v11 = vshrl.u32 %v1835_v44, %v1958_v14 }
  0x2d   : > { %v603_v49 = vadd.s32 %v601_v24, %v595_v23  ;;  %vm604_vm8 = vc.u32 %v602_v42, %v598_v34  ;;  %v623_v52 = vsel %vm622_vm7, 1, %v1836_v46  ;;  %vm263_vm10 = vcmp.lt.s32.totalorder %v1956_v13, 1 }
  0x2e   : > { %v605_v53 = vsel %vm604_vm8, 1, %v1836_v46  ;;  %v625_v54 = vadd.s32 %v623_v52, %v617_v36  ;;  %vm626_vm9 = vc.u32 %v624_v47, %v620_v41  ;;  %v1977_v58 = vadd.s32 %v624_v47, %v620_v41 }
  0x2f   : > { %v607_v56 = vadd.s32 %v605_v53, %v603_v49  ;;  %v627_v57 = vsel %vm626_vm9, 1, %v1836_v46  ;;  %v578_v15 = vsel %vm572_vm3, %v1948_v60, %v577_v61  ;;  %v259_v18 = vor.u32 %v258_v7, %v257_v3 }
  0x30   : > { %v629_v63 = vadd.s32 %v627_v57, %v625_v54  ;;  %vm265_vm11 = vcmp.lt.s32.totalorder %v1956_v13, 3  ;;  %v262_v20 = vor.u32 %v261_v11, %v260_v10  ;;  %vm264_vm12 = vcmp.lt.s32.totalorder %v1956_v13, 2 }
  0x31   : > { %v608_v8 = vadd.s32 %v607_v56, %v597_v32  ;;  %vm266_vm13 = vcmp.lt.s32.totalorder %v1956_v13, 4  ;;  %v271_v21 = vsel %vm263_vm10, %v250_v55, %v1979_v62  ;;  %v632_v60 = vmul.u32 %v1908_v17, %v578_v15 }
  0x32   : > { %v630_v16 = vadd.s32 %v629_v63, %v619_v40  ;;  %v272_v22 = vsel %vm266_vm13, %v259_v18, 920167782  ;;  %v275_v26 = vsel %vm263_vm10, %v1979_v62, %v256_v0  ;;  %v703_v28 = vadd.s32 1, %v1944_v59 }
  0x33   : > { %v1992_v19 = vadd.s32 %v608_v8, %v599_v38  ;;  %v273_v61 = vsel %vm265_vm11, %v256_v0, %v272_v22  ;;  %v276_v30 = vsel %vm266_vm13, %v262_v20, 1326507024  ;;  %v2016_v17 = vshll.u32 %v239_v4, 8 }
  0x34   : > { %v631_v6 = vadd.s32 %v630_v16, %v621_v50  ;;  %v274_v25 = vsel %vm264_vm12, %v271_v21, %v273_v61  ;;  %v247_v38 = vshrl.u32 %v1830_v27, %v1958_v14  ;;  %v277_v39 = vsel %vm265_vm11, %v259_v18, %v276_v30 }
  0x35   : > { %vm634_vm14 = vc.u32 %v1992_v19, %v1977_v58  ;;  %v304_v32 = vand.u32 65535, %v274_v25  ;;  %v305_v34 = vshrl.u32 %v274_v25, 16  ;;  %v278_v59 = vsel %vm264_vm12, %v275_v26, %v277_v39 }
  0x36   : > { %v635_v23 = vadd.s32 1, %v631_v6  ;;  %v280_v41 = vand.u32 65535, %v2016_v17  ;;  %v281_v42 = vshrl.u32 %v2016_v17, 16  ;;  %v282_v51 = vand.u32 65535, %v278_v59 }
  0x37   : > { %v283_v4 = vshrl.u32 %v278_v59, 16  ;;  %vm704_vm15 = vcmp.gt.s32.totalorder %v703_v28, 0  ;;  %v267_v52 = vsel %vm263_vm10, %v247_v38, %v250_v55  ;;  %v268_v7 = vsel %vm266_vm13, %v256_v0, 2102212464 }
  0x38   : > { %v636_v36 = vsel %vm634_vm14, %v635_v23, %v631_v6  ;;  %v307_v45 = vmul.u32 %v305_v34, %v280_v41  ;;  %v308_v24 = vmul.u32 %v304_v32, %v281_v42  ;;  %v284_v47 = vmul.u32 %v282_v51, %v280_v41 }
  0x39   : > { %v637_v40 = vadd.s32 %v636_v36, %v632_v60  ;;  %v285_v48 = vmul.u32 %v283_v4, %v280_v41  ;;  %v286_v14 = vmul.u32 %v282_v51, %v281_v42  ;;  %v306_v49 = vmul.u32 %v304_v32, %v280_v41  ;;  %v2046_v36 = vld [vmem:[%s1893_s22 + $0x8] sm:$0xff] }
  0x3a   : > { %v310_v53 = vshll.u32 %v307_v45, 16  ;;  %v287_v54 = vmul.u32 %v283_v4, %v281_v42  ;;  %v309_v63 = vmul.u32 %v305_v34, %v281_v42  ;;  %v312_v8 = vshll.u32 %v308_v24, 16  ;;  %1566 = vrot.lane.b32.xlu0 %v2046_v36, %s1828_s23  ;;  %1581 = vrot.lane.b32.xlu2 %v2046_v36, %s1829_s24 }
  0x3b   : > { %v638_v43 = vadd.s32 536870912, %v637_v40  ;;  %v288_v56 = vshll.u32 %v285_v48, 16  ;;  %v290_v57 = vshll.u32 %v286_v14, 16  ;;  %v705_v10 = vsel %vm704_vm15, %v703_v28, 0 }
  0x3c   : > { %vm314_vm1 = vc.u32 %v306_v49, %v310_v53  ;;  %v316_v15 = vadd.s32 %v310_v53, %v306_v49  ;;  %v311_v18 = vshrl.u32 %v307_v45, 16  ;;  %v289_v6 = vshrl.u32 %v285_v48, 16 }
  0x3d   : > { %v2026_v50 = vshrl.u32 %v638_v43, 30  ;;  %vm292_vm0 = vc.u32 %v284_v47, %v288_v56  ;;  %v294_v11 = vadd.s32 %v288_v56, %v284_v47  ;;  %v315_v20 = vsel %vm314_vm1, 1, %v1836_v46 }
  0x3e   : > { %v293_v55 = vsel %vm292_vm0, 1, %v1836_v46  ;;  %v317_v22 = vadd.s32 %v315_v20, %v309_v63  ;;  %vm318_vm4 = vc.u32 %v316_v15, %v312_v8  ;;  %v269_v61 = vsel %vm265_vm11, %v1979_v62, %v268_v7 }
  0x3f   : > { %v640_v3 = vshll.u32 %v2026_v50, 30  ;;  %v295_v21 = vadd.s32 %v293_v55, %v287_v54  ;;  %vm296_vm2 = vc.u32 %v294_v11, %v290_v57  ;;  %v291_v23 = vshrl.u32 %v286_v14, 16 }
  0x40   : > { %v297_v60 = vsel %vm296_vm2, 1, %v1836_v46  ;;  %v319_v26 = vsel %vm318_vm4, 1, %v1836_v46  ;;  %v313_v30 = vshrl.u32 %v308_v24, 16  ;;  %v707_v34 = vand.u32 31, %v705_v10 }
  0x41   : > { %v2033_v16 = vsub.s32 %v637_v40, %v640_v3  ;;  %v299_v25 = vadd.s32 %v297_v60, %v295_v21  ;;  %v321_v32 = vadd.s32 %v319_v26, %v317_v22  ;;  %v270_v62 = vsel %vm264_vm12, %v267_v52, %v269_v61 }
  0x42   : > { %v2054_v40 = vadd.s32 %v316_v15, %v312_v8  ;;  %v693_v51 = vand.u32 2147483647, %v1902_v12  ;;  %v2059_v43 = vsub.s32 32, %v707_v34  ;;  %v324_v45 = vmul.u32 %v2016_v17, %v270_v62  ;;  %1583 = vrot.lane.b32.xlu0 %v1898_v9, %s1829_s24 }
  0x43   : > { %vm642_vm3 = vcmp.lt.s32.totalorder %v2033_v16, 0  ;;  %v643_v0 = vsub.s32 0, %v2033_v16  ;;  %v300_v39 = vadd.s32 %v299_v25, %v289_v6  ;;  %v322_v59 = vadd.s32 %v321_v32, %v311_v18 }
  0x44   : > { %v700_v13 = vand.u32 8388607, %v693_v51  ;;  %v2066_v47 = vshrl.u32 %v705_v10, 5  ;;  %v710_v48 = vshll.u32 %v1830_v27, %v707_v34  ;;  %v713_v14 = vshll.u32 %v1831_v29, %v707_v34 }
  0x45   : > { %v644_v28 = vsel %vm642_vm3, %v643_v0, %v2033_v16  ;;  %v2056_v42 = vadd.s32 %v300_v39, %v291_v23  ;;  %v323_v4 = vadd.s32 %v322_v59, %v313_v30  ;;  %v711_v52 = vshrl.u32 %v1831_v29, %v2059_v43 }
  0x46   : > { %v645_v38 = vclz %v644_v28  ;;  %v716_v17 = vshll.u32 %v1832_v31, %v707_v34  ;;  %v719_v53 = vshll.u32 %v1833_v33, %v707_v34  ;;  %v714_v57 = vshrl.u32 %v1832_v31, %v2059_v43 }
  0x47   : > { %vm326_vm6 = vc.u32 %v2056_v42, %v2054_v40  ;;  %v327_v24 = vadd.s32 1, %v323_v4  ;;  %v717_v63 = vshrl.u32 %v1833_v33, %v2059_v43  ;;  %v720_v3 = vshrl.u32 %v1834_v35, %v2059_v43 }
  0x48   : > { %v1747_v41 = vadd.s32 4294967294, %v645_v38  ;;  %v722_v7 = vshll.u32 %v1834_v35, %v707_v34  ;;  %v723_v8 = vshrl.u32 %v1835_v44, %v2059_v43  ;;  %v633_v10 = vadd.s32 %v1977_v58, %v1992_v19 }
  0x49   : > { %v328_v49 = vsel %vm326_vm6, %v327_v24, %v323_v4  ;;  %v701_v15 = vor.u32 8388608, %v700_v13  ;;  %v2087_v18 = vor.u32 %v711_v52, %v710_v48  ;;  %v721_v20 = vor.u32 %v720_v3, %v719_v53 }
  0x4a   : > { %vm1748_vm5 = vcmp.lt.s32.totalorder %v1747_v41, 0  ;;  %v329_v56 = vadd.s32 %v328_v49, %v324_v45  ;;  %vm725_vm7 = vcmp.lt.s32.totalorder %v2066_v47, 1  ;;  %v2092_v6 = vor.u32 %v714_v57, %v713_v14 }
  0x4b   : > { %v648_v54 = vsel %vm1748_vm5, 0, %v1747_v41  ;;  %v2094_v21 = vor.u32 %v717_v63, %v716_v17  ;;  %vm728_vm8 = vcmp.lt.s32.totalorder %v2066_v47, 4  ;;  %v724_v0 = vor.u32 %v723_v8, %v722_v7 }
  0x4c   : > { %v330_v11 = vadd.s32 536870912, %v329_v56  ;;  %v653_v55 = vsub.s32 4294967266, %v648_v54  ;;  %v649_v22 = vsub.s32 32, %v648_v54  ;;  %vm727_vm9 = vcmp.lt.s32.totalorder %v2066_v47, 3 }
  0x4d   : > { %v734_v58 = vsel %vm728_vm8, %v721_v20, 920167782  ;;  %v2101_v60 = vshll.u32 %v701_v15, 8  ;;  %vm726_vm10 = vcmp.lt.s32.totalorder %v2066_v47, 2  ;;  %v733_v25 = vsel %vm725_vm7, %v2087_v18, %v2092_v6 }
  0x4e   : > { %v2090_v9 = vshrl.u32 %v330_v11, 30  ;;  %v654_v61 = vadd.s32 127, %v653_v55  ;;  %v735_v26 = vsel %vm727_vm9, %v2094_v21, %v734_v58  ;;  %v737_v28 = vsel %vm725_vm7, %v2092_v6, %v2094_v21 }
  0x4f   : > { %v650_v30 = vshll.u32 %v2033_v16, %v648_v54  ;;  %v651_v32 = vshrl.u32 %v633_v10, %v649_v22  ;;  %v738_v34 = vsel %vm728_vm8, %v724_v0, 1326507024  ;;  %v742_v62 = vand.u32 65535, %v2101_v60 }
  0x50   : > { %v332_v19 = vshll.u32 %v2090_v9, 30  ;;  %v739_v39 = vsel %vm727_vm9, %v721_v20, %v738_v34  ;;  %v655_v59 = vshll.u32 %v654_v61, 23  ;;  %v736_v41 = vsel %vm726_vm10, %v733_v25, %v735_v26 }
  0x51   : > { %v740_v4 = vsel %vm726_vm10, %v737_v28, %v739_v39  ;;  %v743_v16 = vshrl.u32 %v2101_v60, 16  ;;  %v652_v14 = vor.u32 %v651_v32, %v650_v30  ;;  %v767_v53 = vshrl.u32 %v736_v41, 16 }
  0x52   : > { %v333_v23 = vsub.s32 %v329_v56, %v332_v19  ;;  %v744_v24 = vand.u32 65535, %v740_v4  ;;  %v745_v13 = vshrl.u32 %v740_v4, 16  ;;  %v656_v52 = vor.u32 4788187, %v655_v59 }
  0x53   : > { %v766_v63 = vand.u32 65535, %v736_v41  ;;  %v325_v3 = vadd.s32 %v2054_v40, %v2056_v42  ;;  %v659_v7 = vcvt.s32.f32 %v652_v14  ;;  %v769_v20 = vmul.u32 %v767_v53, %v742_v62 }
  0x54   : > { %vm334_vm11 = vcmp.lt.s32.totalorder %v333_v23, 0  ;;  %v335_v38 = vsub.s32 0, %v333_v23  ;;  %v747_v49 = vmul.u32 %v745_v13, %v742_v62  ;;  %v746_v54 = vmul.u32 %v744_v24, %v742_v62 }
  0x55   : > { %v748_v56 = vmul.u32 %v744_v24, %v743_v16  ;;  %v749_v10 = vmul.u32 %v745_v13, %v743_v16  ;;  %v657_v11 = vand.u32 2147483647, %v656_v52  ;;  %v770_v0 = vmul.u32 %v766_v63, %v743_v16 }
  0x56   : > { %v336_v45 = vsel %vm334_vm11, %v335_v38, %v333_v23  ;;  %v750_v57 = vshll.u32 %v747_v49, 16  ;;  %v768_v30 = vmul.u32 %v766_v63, %v742_v62  ;;  %v772_v32 = vshll.u32 %v769_v20, 16  ;;  %v224_v62 = vld [vmem:[%s2508_s0 + $0x8] sm:$0xff] }
  0x57   : > { %v337_v48 = vclz %v336_v45  ;;  %v752_v22 = vshll.u32 %v748_v56, 16  ;;  %v660_v40 = vmul.f32 %v659_v7, %v657_v11  ;;  %v751_v34 = vshrl.u32 %v747_v49, 16 }
  0x58   : > { %vm754_vm13 = vc.u32 %v746_v54, %v750_v57  ;;  %v756_v26 = vadd.s32 %v750_v57, %v746_v54  ;;  %v771_v38 = vmul.u32 %v767_v53, %v743_v16  ;;  %v774_v4 = vshll.u32 %v770_v0, 16 }
  0x59   : > { %v1741_v17 = vadd.s32 4294967294, %v337_v48  ;;  %v755_v25 = vsel %vm754_vm13, 1, %v1836_v46  ;;  %vm541_vm15 = vcmp.lt.s32.totalorder %v1873_v1, 0  ;;  %vm776_vm0 = vc.u32 %v768_v30, %v772_v32 }
  0x5a   : > { %v757_v28 = vadd.s32 %v755_v25, %v749_v10  ;;  %vm758_vm14 = vc.u32 %v756_v26, %v752_v22  ;;  %v661_v24 = vxor.u32 2147483648, %v660_v40  ;;  %v730_v16 = vsel %vm728_vm8, %v2094_v21, 2102212464 }
  0x5b   : > { %vm1742_vm12 = vcmp.lt.s32.totalorder %v1741_v17, 0  ;;  %v759_v41 = vsel %vm758_vm14, 1, %v1836_v46  ;;  %v777_v13 = vsel %vm776_vm0, 1, %v1836_v46  ;;  %v778_v48 = vadd.s32 %v772_v32, %v768_v30 }
  0x5c   : > { %v340_v8 = vsel %vm1742_vm12, 0, %v1741_v17  ;;  %v761_v45 = vadd.s32 %v759_v41, %v757_v28  ;;  %v753_v14 = vshrl.u32 %v748_v56, 16  ;;  %v773_v52 = vshrl.u32 %v769_v20, 16 }
  0x5d   : > { %v341_v15 = vsub.s32 32, %v340_v8  ;;  %v345_v55 = vsub.s32 4294967266, %v340_v8  ;;  %v342_v58 = vshll.u32 %v333_v23, %v340_v8  ;;  %v709_v23 = vshrl.u32 %v1830_v27, %v2059_v43 }
  0x5e   : > { %v762_v49 = vadd.s32 %v761_v45, %v751_v34  ;;  %v779_v17 = vadd.s32 %v777_v13, %v771_v38  ;;  %vm780_vm1 = vc.u32 %v778_v48, %v774_v4  ;;  %v2140_v54 = vmul.f32 6.2831855, %v224_v62 }
  0x5f   : > { %v343_v19 = vshrl.u32 %v325_v3, %v341_v15  ;;  %v346_v61 = vadd.s32 127, %v345_v55  ;;  %v729_v57 = vsel %vm725_vm7, %v709_v23, %v2087_v18  ;;  %v731_v21 = vsel %vm727_vm9, %v2092_v6, %v730_v16 }
  0x60   : > { %v781_v63 = vsel %vm780_vm1, 1, %v1836_v46  ;;  %v775_v3 = vshrl.u32 %v770_v0, 16  ;;  %v388_v7 = vand.u32 2139095040, %v2140_v54  ;;  %vm2152_vm2 = vcmp.le.f32.partialorder %v539_v2, 0.7853982 }
  0x61   : > { %v347_v42 = vshll.u32 %v346_v61, 23  ;;  %v344_v39 = vor.u32 %v343_v19, %v342_v58  ;;  %v783_v56 = vadd.s32 %v781_v63, %v779_v17  ;;  %v662_v10 = vsel %vm541_vm15, %v661_v24, %v660_v40 }
  0x62   : > { %v2158_v18 = vadd.s32 %v762_v49, %v753_v14  ;;  %v2160_v11 = vadd.s32 %v778_v48, %v774_v4  ;;  %v732_v15 = vsel %vm726_vm10, %v729_v57, %v731_v21  ;;  %v389_v20 = vshrl.u32 %v388_v7, 23 }
  0x63   : > { %v348_v59 = vor.u32 4788187, %v347_v42  ;;  %v351_v43 = vcvt.s32.f32 %v344_v39  ;;  %v784_v55 = vadd.s32 %v783_v56, %v773_v52  ;;  %v2167_v2 = vsel %vm2152_vm2, %v1873_v1, %v662_v10 }
  0x64   : > { %v1743_v0 = vadd.s32 4294967169, %v389_v20  ;;  %v786_v58 = vmul.u32 %v2101_v60, %v732_v15  ;;  %vm788_vm3 = vc.u32 %v2158_v18, %v2160_v11  ;;  %v2174_v47 = vmul.f32 %v2167_v2, %v2167_v2 }
  0x65   : > { %v349_v53 = vand.u32 2147483647, %v348_v59  ;;  %v785_v22 = vadd.s32 %v784_v55, %v775_v3  ;;  %vm233_vm4 = vcmp.lt.s32.totalorder %v1883_v5, 0  ;;  %v385_v30 = vand.u32 2147483647, %v2140_v54 }
  0x66   : > { %v395_v25 = vadd.s32 1, %v1743_v0  ;;  %vm2180_vm6 = vcmp.le.f32.partialorder %v231_v37, 0.7853982  ;;  %v675_v34 = vmul.f32 -0.00019511016, %v2174_v47  ;;  %vm695_vm13 = vcmp.lt.s32.totalorder %v1902_v12, 0 }
  0x67   : > { %v352_v6 = vmul.f32 %v351_v43, %v349_v53  ;;  %v789_v61 = vadd.s32 1, %v785_v22  ;;  %v668_v59 = vmul.f32 -0.001358992, %v2174_v47  ;;  %v392_v4 = vand.u32 8388607, %v385_v30 }
  0x68   : > { %vm396_vm5 = vcmp.gt.s32.totalorder %v395_v25, 0  ;;  %v676_v16 = vadd.f32 0.008332121, %v675_v34  ;;  %vm2268_vm14 = vcmp.le.f32.partialorder %v693_v51, 0.7853982 }
  0x69   : > { %v353_v19 = vxor.u32 2147483648, %v352_v6  ;;  %v790_v26 = vsel %vm788_vm3, %v789_v61, %v785_v22  ;;  %v397_v40 = vsel %vm396_vm5, %v395_v25, 0  ;;  %v669_v53 = vadd.f32 0.041655596, %v668_v59 }
  0x6a   : > { %v791_v28 = vadd.s32 %v790_v26, %v786_v58  ;;  %v399_v32 = vand.u32 31, %v397_v40  ;;  %v2207_v14 = vshrl.u32 %v397_v40, 5  ;;  %v393_v57 = vor.u32 8388608, %v392_v4 }
  0x6b   : > { %v354_v42 = vsel %vm233_vm4, %v353_v19, %v352_v6  ;;  %v677_v7 = vmul.f32 %v676_v16, %v2174_v47  ;;  %v670_v0 = vmul.f32 %v669_v53, %v2174_v47  ;;  %v787_v25 = vadd.s32 %v2160_v11, %v2158_v18 }
  0x6c   : > { %v792_v38 = vadd.s32 536870912, %v791_v28  ;;  %v2187_v39 = vsub.s32 32, %v399_v32  ;;  %v2193_v41 = vsel %vm2180_vm6, %v1883_v5, %v354_v42  ;;  %v402_v23 = vshll.u32 %v1830_v27, %v399_v32 }
  0x6d   : > { %v405_v62 = vshll.u32 %v1831_v29, %v399_v32  ;;  %v411_v24 = vshll.u32 %v1833_v33, %v399_v32  ;;  %v408_v49 = vshll.u32 %v1832_v31, %v399_v32  ;;  %v414_v56 = vshll.u32 %v1834_v35, %v399_v32 }
  0x6e   : > { %v2195_v37 = vshrl.u32 %v792_v38, 30  ;;  %v403_v45 = vshrl.u32 %v1831_v29, %v2187_v39  ;;  %v406_v48 = vshrl.u32 %v1832_v31, %v2187_v39  ;;  %v409_v52 = vshrl.u32 %v1833_v33, %v2187_v39 }
  0x6f   : > { %v412_v17 = vshrl.u32 %v1834_v35, %v2187_v39  ;;  %v2216_v29 = vmul.f32 %v2193_v41, %v2193_v41  ;;  %v415_v33 = vshrl.u32 %v1835_v44, %v2187_v39  ;;  %vm417_vm8 = vcmp.lt.s32.totalorder %v2207_v14, 1 }
  0x70   : > { %v794_v13 = vshll.u32 %v2195_v37, 30  ;;  %v2218_v21 = vor.u32 %v403_v45, %v402_v23  ;;  %v2220_v63 = vor.u32 %v406_v48, %v405_v62  ;;  %v410_v6 = vor.u32 %v409_v52, %v408_v49 }
  0x71   : > { %v413_v3 = vor.u32 %v412_v17, %v411_v24  ;;  %v360_v10 = vmul.f32 -0.001358992, %v2216_v29  ;;  %v416_v55 = vor.u32 %v415_v33, %v414_v56  ;;  %vm419_vm9 = vcmp.lt.s32.totalorder %v2207_v14, 3 }
  0x72   : > { %v795_v43 = vsub.s32 %v791_v28, %v794_v13  ;;  %vm420_vm10 = vcmp.lt.s32.totalorder %v2207_v14, 4  ;;  %v367_v20 = vmul.f32 -0.00019511016, %v2216_v29  ;;  %vm418_vm11 = vcmp.lt.s32.totalorder %v2207_v14, 2 }
  0x73   : > { %v2232_v35 = vshll.u32 %v393_v57, 8  ;;  %v663_v44 = vsub.s32 4, %v2026_v50  ;;  %v425_v58 = vsel %vm417_vm8, %v2218_v21, %v2220_v63  ;;  %v426_v19 = vsel %vm420_vm10, %v413_v3, 920167782 }
  0x74   : > { %vm796_vm7 = vcmp.lt.s32.totalorder %v795_v43, 0  ;;  %v797_v31 = vsub.s32 0, %v795_v43  ;;  %v678_v61 = vadd.f32 -0.16666654, %v677_v7  ;;  %v427_v28 = vsel %vm419_vm9, %v410_v6, %v426_v19 }
  0x75   : > { %v361_v40 = vadd.f32 0.041655596, %v360_v10  ;;  %v428_v42 = vsel %vm418_vm11, %v425_v58, %v427_v28  ;;  %v429_v32 = vsel %vm417_vm8, %v2220_v63, %v410_v6  ;;  %v430_v34 = vsel %vm420_vm10, %v416_v55, 1326507024 }
  0x76   : > { %v798_v15 = vsel %vm796_vm7, %v797_v31, %v795_v43  ;;  %v368_v38 = vadd.f32 0.008332121, %v367_v20  ;;  %v431_v18 = vsel %vm419_vm9, %v413_v3, %v430_v34  ;;  %v434_v11 = vand.u32 65535, %v2232_v35 }
  0x77   : > { %v799_v22 = vclz %v798_v15  ;;  %v432_v4 = vsel %vm418_vm11, %v429_v32, %v431_v18  ;;  %v435_v23 = vshrl.u32 %v2232_v35, 16  ;;  %v459_v45 = vshrl.u32 %v428_v42, 16 }
  0x78   : > { %v458_v13 = vand.u32 65535, %v428_v42  ;;  %v664_v48 = vsel %vm541_vm15, %v663_v44, %v2026_v50  ;;  %v671_v49 = vadd.f32 -0.4999988, %v670_v0  ;;  %v436_v52 = vand.u32 65535, %v432_v4 }
  0x79   : > { %v1750_v26 = vadd.s32 4294967294, %v799_v22  ;;  %v437_v17 = vshrl.u32 %v432_v4, 16  ;;  %v679_v53 = vmul.f32 %v678_v61, %v2174_v47  ;;  %v362_v57 = vmul.f32 %v361_v40, %v2216_v29 }
  0x7a   : > { %v438_v56 = vmul.u32 %v436_v52, %v434_v11  ;;  %v461_v7 = vmul.u32 %v459_v45, %v434_v11  ;;  %v369_v10 = vmul.f32 %v368_v38, %v2216_v29  ;;  %v462_v20 = vmul.u32 %v458_v13, %v435_v23 }
  0x7b   : > { %vm1751_vm12 = vcmp.lt.s32.totalorder %v1750_v26, 0  ;;  %v439_v33 = vmul.u32 %v437_v17, %v434_v11  ;;  %v401_v22 = vshrl.u32 %v1830_v27, %v2187_v39  ;;  %v441_v44 = vmul.u32 %v437_v17, %v435_v23 }
  0x7c   : > { %v802_v59 = vsel %vm1751_vm12, 0, %v1750_v26  ;;  %v460_v58 = vmul.u32 %v458_v13, %v434_v11  ;;  %v463_v28 = vmul.u32 %v459_v45, %v435_v23  ;;  %v464_v40 = vshll.u32 %v461_v7, 16 }
  0x7d   : > { %v803_v62 = vsub.s32 32, %v802_v59  ;;  %v804_v24 = vshll.u32 %v795_v43, %v802_v59  ;;  %v807_v16 = vsub.s32 4294967266, %v802_v59  ;;  %v440_v43 = vmul.u32 %v436_v52, %v435_v23 }
  0x7e   : > { %v442_v0 = vshll.u32 %v439_v33, 16  ;;  %v443_v32 = vshrl.u32 %v439_v33, 16  ;;  %v466_v38 = vshll.u32 %v462_v20, 16  ;;  %vm468_vm1 = vc.u32 %v460_v58, %v464_v40 }
  0x7f   : > { %v805_v3 = vshrl.u32 %v787_v25, %v803_v62  ;;  %v808_v31 = vadd.s32 127, %v807_v16  ;;  %v422_v25 = vsel %vm420_vm10, %v410_v6, 2102212464  ;;  %v444_v26 = vshll.u32 %v440_v43, 16 }
  0x80   : > { %vm446_vm15 = vc.u32 %v438_v56, %v442_v0  ;;  %v448_v51 = vadd.s32 %v442_v0, %v438_v56  ;;  %v470_v27 = vadd.s32 %v464_v40, %v460_v58  ;;  %v445_v11 = vshrl.u32 %v440_v43, 16 }
  0x81   : > { %v806_v15 = vor.u32 %v805_v3, %v804_v24  ;;  %v809_v55 = vshll.u32 %v808_v31, 23  ;;  %v447_v34 = vsel %vm446_vm15, 1, %v1836_v46  ;;  %v469_v6 = vsel %vm468_vm1, 1, %v1836_v46 }
  0x82   : > { %v449_v18 = vadd.s32 %v447_v34, %v441_v44  ;;  %vm450_vm0 = vc.u32 %v448_v51, %v444_v26  ;;  %v465_v62 = vshrl.u32 %v461_v7, 16  ;;  %v471_v24 = vadd.s32 %v469_v6, %v463_v28 }
  0x83   : > { %v810_v19 = vor.u32 4788187, %v809_v55  ;;  %v813_v61 = vcvt.s32.f32 %v806_v15  ;;  %v451_v59 = vsel %vm450_vm0, 1, %v1836_v46  ;;  %vm472_vm3 = vc.u32 %v470_v27, %v466_v38 }
  0x84   : > { %v453_v4 = vadd.s32 %v451_v59, %v449_v18  ;;  %v421_v45 = vsel %vm417_vm8, %v401_v22, %v2218_v21  ;;  %v423_v16 = vsel %vm419_vm9, %v2220_v63, %v422_v25  ;;  %v473_v13 = vsel %vm472_vm3, 1, %v1836_v46 }
  0x85   : > { %v811_v42 = vand.u32 2147483647, %v810_v19  ;;  %v370_v52 = vadd.f32 -0.16666654, %v369_v10  ;;  %v467_v3 = vshrl.u32 %v462_v20, 16  ;;  %v475_v31 = vadd.s32 %v473_v13, %v471_v24 }
  0x86   : > { %v454_v17 = vadd.s32 %v453_v4, %v443_v32  ;;  %v2288_v33 = vadd.s32 %v470_v27, %v466_v38  ;;  %v424_v21 = vsel %vm418_vm11, %v421_v45, %v423_v16  ;;  %v2301_v7 = vsel %vm2152_vm2, 0, %v664_v48 }
  0x87   : > { %v814_v39 = vmul.f32 %v813_v61, %v811_v42  ;;  %v476_v46 = vadd.s32 %v475_v31, %v465_v62  ;;  %v672_v10 = vmul.f32 %v671_v49, %v2174_v47  ;;  %v355_v15 = vsub.s32 4, %v2090_v9 }
  0x88   : > { %v2297_v63 = vadd.s32 %v454_v17, %v445_v11  ;;  %v680_v20 = vadd.f32 1.0, %v679_v53  ;;  %v363_v22 = vadd.f32 -0.4999988, %v362_v57  ;;  %v371_v44 = vmul.f32 %v370_v52, %v2216_v29 }
  0x89   : > { %v815_v23 = vxor.u32 2147483648, %v814_v39  ;;  %v477_v14 = vadd.s32 %v476_v46, %v467_v3  ;;  %v478_v19 = vmul.u32 %v2232_v35, %v424_v21  ;;  %v683_v8 = vand.u32 3, %v2301_v7 }
  0x8a   : > { %vm480_vm2 = vc.u32 %v2297_v63, %v2288_v33  ;;  %v2312_v48 = vadd.f32 1.0, %v672_v10  ;;  %v356_v49 = vsel %vm233_vm4, %v355_v15, %v2090_v9  ;;  %v2318_v61 = vmul.f32 %v680_v20, %v2167_v2  ;;  %v1801_v20 = vld [vmem:[%s1893_s22 + $0x10] sm:$0xff] }
  0x8b   : > { %v816_v56 = vsel %vm695_vm13, %v815_v23, %v814_v39  ;;  %v481_v47 = vadd.s32 1, %v477_v14  ;;  %v364_v25 = vmul.f32 %v363_v22, %v2216_v29  ;;  %v372_v35 = vadd.f32 1.0, %v371_v44 }
  0x8c   : > { %v2293_v43 = vsel %vm2268_vm14, %v1902_v12, %v816_v56  ;;  %vm685_vm5 = vcmp.eq.s32.totalorder %v683_v8, 0  ;;  %vm688_vm7 = vcmp.eq.s32.totalorder %v683_v8, 2  ;;  %v2323_v40 = vsel %vm2180_vm6, 0, %v356_v49 }
  0x8d   : > { %v821_v55 = vmul.f32 %v2293_v43, %v2293_v43  ;;  %v482_v26 = vsel %vm480_vm2, %v481_v47, %v477_v14  ;;  %v689_v9 = vxor.u32 2147483648, %v2312_v48  ;;  %v375_v32 = vand.u32 3, %v2323_v40 }
  0x8e   : > { %v483_v28 = vadd.s32 %v482_v26, %v478_v19  ;;  %v686_v38 = vxor.u32 2147483648, %v2318_v61  ;;  %v2328_v29 = vadd.f32 1.0, %v364_v25  ;;  %v2331_v18 = vmul.f32 %v372_v35, %v2193_v41 }
  0x8f   : > { %v822_v0 = vmul.f32 -0.001358992, %v821_v55  ;;  %v829_v58 = vmul.f32 -0.00019511016, %v821_v55  ;;  %v817_v27 = vsub.s32 4, %v2195_v37  ;;  %vm684_vm4 = vcmp.lt.s32.totalorder %v683_v8, 2 }
  0x90   : > { %v484_v2 = vadd.s32 536870912, %v483_v28  ;;  %v687_v60 = vsel %vm685_vm5, %v2312_v48, %v686_v38  ;;  %v690_v11 = vsel %vm688_vm7, %v689_v9, %v2318_v61  ;;  %vm377_vm6 = vcmp.eq.s32.totalorder %v375_v32, 0 }
  0x91   : > { %v823_v53 = vadd.f32 0.041655596, %v822_v0  ;;  %v830_v57 = vadd.f32 0.008332121, %v829_v58  ;;  %vm380_vm8 = vcmp.eq.s32.totalorder %v375_v32, 2  ;;  %v378_v4 = vxor.u32 2147483648, %v2331_v18 }
  0x92   : > { %v2334_v39 = vshrl.u32 %v484_v2, 30  ;;  %v381_v62 = vxor.u32 2147483648, %v2328_v29  ;;  %v818_v24 = vsel %vm695_vm13, %v817_v27, %v2195_v37  ;;  %vm682_vm9 = vweird.f32 %v1873_v1 }
  0x93   : > { %v831_v51 = vmul.f32 %v830_v57, %v821_v55  ;;  %v824_v42 = vmul.f32 %v823_v53, %v821_v55  ;;  %v691_v23 = vsel %vm684_vm4, %v687_v60, %v690_v11  ;;  %vm376_vm10 = vcmp.lt.s32.totalorder %v375_v32, 2  ;;  %v2373_v53 = vpop.permute.xlu0 %1564 }
  0x94   : > { %v486_v41 = vshll.u32 %v2334_v39, 30  ;;  %v379_v16 = vsel %vm377_vm6, %v2328_v29, %v378_v4  ;;  %v382_v13 = vsel %vm380_vm8, %v381_v62, %v2331_v18  ;;  %v820_v17 = vsel %vm2268_vm14, 0, %v818_v24 }
  0x95   : > { %v832_v34 = vadd.f32 -0.16666654, %v831_v51  ;;  %v825_v59 = vadd.f32 -0.4999988, %v824_v42  ;;  %v692_v31 = vsel %vm682_vm9, nan, %v691_v23  ;;  %v837_v56 = vand.u32 3, %v820_v17 }
  0x96   : > { %v487_v45 = vsub.s32 %v483_v28, %v486_v41  ;;  %v383_v21 = vsel %vm376_vm10, %v379_v16, %v382_v13  ;;  %v2360_v22 = vmul.f32 %v1801_v20, %v692_v31  ;;  %vm374_vm12 = vweird.f32 %v1883_v5  ;;  %v1803_v20 = vld [vmem:[%s1893_s22 + $0x18] sm:$0xff] }
  0x97   : > { %v833_v6 = vmul.f32 %v832_v34, %v821_v55  ;;  %v826_v52 = vmul.f32 %v825_v59, %v821_v55  ;;  %v384_v50 = vsel %vm374_vm12, nan, %v383_v21  ;;  %vm836_vm13 = vweird.f32 %v1902_v12 }
  0x98   : > { %vm488_vm11 = vcmp.lt.s32.totalorder %v487_v45, 0  ;;  %v489_v37 = vsub.s32 0, %v487_v45  ;;  %vm838_vm14 = vcmp.lt.s32.totalorder %v837_v56, 2  ;;  %vm839_vm15 = vcmp.eq.s32.totalorder %v837_v56, 0 }
  0x99   : > { %v834_v3 = vadd.f32 1.0, %v833_v6  ;;  %v827_v10 = vadd.f32 1.0, %v826_v52  ;;  %vm842_vm0 = vcmp.eq.s32.totalorder %v837_v56, 2  ;;  %v1301_v14 = vadd.s32 3, %v2301_v7 }
  0x9a   : > { %v490_v46 = vsel %vm488_vm11, %v489_v37, %v487_v45  ;;  %v1456_v0 = vadd.s32 3, %v820_v17  ;;  %v479_v19 = vadd.s32 %v2288_v33, %v2297_v63  ;;  %v509_v8 = vsub.s32 4, %v2334_v39 }
  0x9b   : > { %v491_v15 = vclz %v490_v46  ;;  %v835_v55 = vmul.f32 %v834_v3, %v2293_v43  ;;  %v843_v58 = vxor.u32 2147483648, %v827_v10  ;;  %v2371_v43 = vpop.permute.xlu1 %1568  ;;  %v1302_v57 = vand.u32 3, %v1301_v14  ;;  %v2404_v3 = vpop.permute.xlu2 %1579  ;;  %v1802_v46 = vld [vmem:[%s1893_s22] sm:$0xff] }
  0x9c   : > { %v1457_v25 = vand.u32 3, %v1456_v0  ;;  %v1467_v28 = vlaneseq  ;;  %vm387_vm8 = vcmp.lt.s32.totalorder %v2140_v54, 0  ;;  %vm2412_vm10 = vcmp.le.f32.partialorder %v385_v30, 0.7853982 }
  0x9d   : > { %v1744_v44 = vadd.s32 4294967294, %v491_v15  ;;  %v840_v47 = vxor.u32 2147483648, %v835_v55  ;;  %v844_v35 = vsel %vm842_vm0, %v843_v58, %v835_v55  ;;  %vm1304_vm3 = vcmp.eq.s32.totalorder %v1302_v57, 0 }
  0x9e   : > { %vm1307_vm2 = vcmp.eq.s32.totalorder %v1302_v57, 2  ;;  %vm1459_vm5 = vcmp.eq.s32.totalorder %v1457_v25, 0  ;;  %vm1303_vm7 = vcmp.lt.s32.totalorder %v1302_v57, 2  ;;  %v1306_v32 = vsel %vm1304_vm3, %v2312_v48, %v686_v38 }
  0x9f   : > { %vm1745_vm1 = vcmp.lt.s32.totalorder %v1744_v44, 0  ;;  %v841_v33 = vsel %vm839_vm15, %v827_v10, %v840_v47  ;;  %v1309_v34 = vsel %vm1307_vm2, %v689_v9, %v2318_v61  ;;  %vm1458_vm4 = vcmp.lt.s32.totalorder %v1457_v25, 2 }
  0xa0   : > { %v494_v49 = vsel %vm1745_vm1, 0, %v1744_v44  ;;  %v1461_v2 = vsel %vm1459_vm5, %v827_v10, %v840_v47  ;;  %v1310_v11 = vsel %vm1303_vm7, %v1306_v32, %v1309_v34  ;;  %vm1462_vm6 = vcmp.eq.s32.totalorder %v1457_v25, 2 }
  0xa1   : > { %v495_v26 = vsub.s32 32, %v494_v49  ;;  %v496_v51 = vshll.u32 %v487_v45, %v494_v49  ;;  %v499_v7 = vsub.s32 4294967266, %v494_v49  ;;  %v845_v59 = vsel %vm838_vm14, %v841_v33, %v844_v35 }
  0xa2   : > { %v2385_v6 = vsel %vm682_vm9, nan, %v1310_v11  ;;  %v1464_v41 = vsel %vm1462_vm6, %v843_v58, %v835_v55  ;;  %v2387_v24 = vand.u32 127, %v1467_v28  ;;  %v991_v61 = vadd.s32 3, %v2323_v40 }
  0xa3   : > { %v497_v63 = vshrl.u32 %v479_v19, %v495_v26  ;;  %v500_v42 = vadd.s32 127, %v499_v7  ;;  %v1465_v45 = vsel %vm1458_vm4, %v1461_v2, %v1464_v41  ;;  %v1571_v48 = vpop.permute.xlu1 %1570  ;;  %v846_v52 = vsel %vm836_vm13, nan, %v845_v59 }
  0xa4   : > { %v2393_v9 = vsel %vm836_vm13, nan, %v1465_v45  ;;  %v1470_v1 = vadd.s32 256, %v2387_v24  ;;  %v1471_v16 = vadd.s32 384, %v2387_v24  ;;  %v510_v40 = vsel %vm387_vm8, %v509_v8, %v2334_v39 }
  0xa5   : > { %v498_v27 = vor.u32 %v497_v63, %v496_v51  ;;  %v501_v60 = vshll.u32 %v500_v42, 23  ;;  %v1530_v37 = vsub.f32 0.0, %v2385_v6  ;;  %v1531_v21 = vsub.f32 0.0, %v2393_v9 }
  0xa6   : > { %v1490_v31 = vand.u32 1, %v1470_v1  ;;  %v1497_v56 = vand.u32 1, %v1471_v16  ;;  %vm1574_vm9 = vcmp.lt.s32.totalorder %v2387_v24, 127  ;;  %v1592_v10 = vmul.f32 %v1802_v46, %v384_v50 }
  0xa7   : > { %v502_v38 = vor.u32 4788187, %v501_v60  ;;  %v505_v23 = vcvt.s32.f32 %v498_v27  ;;  %v992_v39 = vand.u32 3, %v991_v61  ;;  %v1595_v55 = vmul.f32 %v1803_v20, %v846_v52  ;;  %v1582_v27 = vpop.permute.xlu2 %1581 }
  0xa8   : > { %v512_v44 = vsel %vm2412_vm10, 0, %v510_v40  ;;  %vm2419_vm11 = vcmp.eq.s32.totalorder %v1490_v31, 0  ;;  %vm2423_vm13 = vcmp.eq.s32.totalorder %v1497_v56, 0  ;;  %v1575_v58 = vsel %vm1574_vm9, %v2371_v43, %v1571_v48 }
  0xa9   : > { %v503_v17 = vand.u32 2147483647, %v502_v38  ;;  %v1534_v30 = vsel %vm2419_vm11, %v1530_v37, 0.0  ;;  %v1476_v19 = vand.u32 1, %v2387_v24  ;;  %v1535_v8 = vsel %vm2423_vm13, %v1531_v21, 0.0 }
  0xaa   : > { %v1578_v47 = vsel %vm1574_vm9, %v1571_v48, %v2373_v53  ;;  %vm993_vm14 = vcmp.lt.s32.totalorder %v992_v39, 2  ;;  %vm994_vm15 = vcmp.eq.s32.totalorder %v992_v39, 0  ;;  %v1146_v57 = vadd.s32 3, %v512_v44 }
  0xab   : > { %v506_v15 = vmul.f32 %v505_v23, %v503_v17  ;;  %v996_v25 = vsel %vm994_vm15, %v2328_v29, %v378_v4  ;;  %vm997_vm0 = vcmp.eq.s32.totalorder %v992_v39, 2  ;;  %v1586_v35 = vpop.permute.xlu1 %1585  ;;  %v1598_v51 = vmul.f32 %v1575_v58, %v1534_v30 }
  0xac   : > { %v2397_v13 = vpop.permute.xlu0 %1566  ;;  %vm1587_vm1 = vcmp.lt.s32.totalorder %v2387_v24, 1  ;;  %v999_v7 = vsel %vm997_vm0, %v381_v62, %v2331_v18  ;;  %v1599_v33 = vmul.f32 %v1578_v47, %v1535_v8  ;;  %vm2450_vm3 = vcmp.eq.s32.totalorder %v1476_v19, 0 }
  0xad   : > { %v507_v50 = vxor.u32 2147483648, %v506_v15  ;;  %v1000_v63 = vsel %vm993_vm14, %v996_v25, %v999_v7  ;;  %v1577_v34 = vsel %vm1574_vm9, %v2373_v53, %v2397_v13  ;;  %v1591_v29 = vsel %vm1587_vm1, %v1586_v35, %v2404_v3 }
  0xae   : > { %v1001_v32 = vsel %vm374_vm12, nan, %v1000_v63  ;;  %v1542_v18 = vsel %vm2419_vm11, 0.0, %v2385_v6  ;;  %v1602_v11 = vadd.f32 %v1598_v51, %v2360_v22  ;;  %v1543_v53 = vsel %vm2423_vm13, 0.0, %v2393_v9 }
  0xaf   : > { %v508_v49 = vsel %vm387_vm8, %v507_v50, %v506_v15  ;;  %v1528_v60 = vsub.f32 0.0, %v1001_v32  ;;  %v1540_v5 = vsel %vm2450_vm3, 0.0, %v1001_v32  ;;  %v1603_v48 = vadd.f32 %v1599_v33, %v1595_v55 }
  0xb0   : > { %v511_v26 = vsel %vm2412_vm10, %v2140_v54, %v508_v49  ;;  %v1604_v1 = vmul.f32 %v1591_v29, %v1540_v5  ;;  %v529_v56 = vand.u32 3, %v512_v44  ;;  %v1147_v21 = vand.u32 3, %v1146_v57 }
  0xb1   : > { %v513_v28 = vmul.f32 %v511_v26, %v511_v26  ;;  %v1532_v23 = vsel %vm2450_vm3, %v1528_v60, 0.0  ;;  %v1469_v55 = vadd.s32 128, %v2387_v24  ;;  %vm528_vm8 = vweird.f32 %v2140_v54 }
  0xb2   : > { %v1596_v61 = vmul.f32 %v1577_v34, %v1532_v23  ;;  %vm534_vm12 = vcmp.eq.s32.totalorder %v529_v56, 2  ;;  %vm1152_vm2 = vcmp.eq.s32.totalorder %v1147_v21, 2  ;;  %vm530_vm5 = vcmp.lt.s32.totalorder %v529_v56, 2 }
  0xb3   : > { %v514_v62 = vmul.f32 -0.001358992, %v513_v28  ;;  %v521_v2 = vmul.f32 -0.00019511016, %v513_v28  ;;  %vm531_vm7 = vcmp.eq.s32.totalorder %v529_v56, 0  ;;  %vm1148_vm4 = vcmp.lt.s32.totalorder %v1147_v21, 2 }
  0xb4   : > { %v1584_v4 = vpop.permute.xlu0 %1583  ;;  %v1600_v9 = vadd.f32 %v1596_v61, %v1592_v10  ;;  %vm1149_vm6 = vcmp.eq.s32.totalorder %v1147_v21, 0  ;;  %v1483_v30 = vand.u32 1, %v1469_v55  ;;  %v1590_v54 = vsel %vm1587_vm1, %v2404_v3, %v1582_v27 }
  0xb5   : > { %v1588_v59 = vsel %vm1587_vm1, %v1584_v4, %v1586_v35  ;;  %v1589_v6 = vsel %vm1587_vm1, %v1582_v27, %v1584_v4  ;;  %v515_v41 = vadd.f32 0.041655596, %v514_v62  ;;  %v522_v38 = vadd.f32 0.008332121, %v521_v2 }
  0xb6   : > { %v1606_v45 = vmul.f32 %v1589_v6, %v1542_v18  ;;  %v1607_v22 = vmul.f32 %v1588_v59, %v1543_v53  ;;  %v1608_v46 = vadd.f32 %v1604_v1, %v1600_v9  ;;  %vm1521_vm10 = vcmp.eq.s32.totalorder %v1483_v30, 0 }
  0xb7   : > { %v516_v16 = vmul.f32 %v515_v41, %v513_v28  ;;  %v523_v52 = vmul.f32 %v522_v38, %v513_v28  ;;  %v1576_v35 = vsel %vm1574_vm9, %v2397_v13, %v2371_v43 }
  0xb8   : > { %v1610_v17 = vadd.f32 %v1606_v45, %v1602_v11  ;;  %v1611_v40 = vadd.f32 %v1607_v22, %v1603_v48  ;;  %1612 = vst [vmem:[%s2483_s29] sm:$0xff] %v1608_v46 }
  0xb9   : > { %v517_v37 = vadd.f32 -0.4999988, %v516_v16  ;;  %v524_v31 = vadd.f32 -0.16666654, %v523_v52 }
  0xba   : > { %1614 = vst [vmem:[%s2483_s29 + $0x10] sm:$0xff] %v1610_v17 }
  0xbb   : > { %1615 = vst [vmem:[%s2483_s29 + $0x18] sm:$0xff] %v1611_v40  ;;  %v518_v12 = vmul.f32 %v517_v37, %v513_v28  ;;  %v525_v15 = vmul.f32 %v524_v31, %v513_v28 }
  0xbd   : > { %v519_v39 = vadd.f32 1.0, %v518_v12  ;;  %v526_v20 = vadd.f32 1.0, %v525_v15 }
  0xbf   : > { %v527_v14 = vmul.f32 %v526_v20, %v511_v26  ;;  %v535_v0 = vxor.u32 2147483648, %v519_v39 }
  0xc1   : > { %v532_v10 = vxor.u32 2147483648, %v527_v14  ;;  %v536_v44 = vsel %vm534_vm12, %v535_v0, %v527_v14  ;;  %v1154_v50 = vsel %vm1152_vm2, %v535_v0, %v527_v14 }
  0xc3   : > { %v533_v58 = vsel %vm531_vm7, %v519_v39, %v532_v10  ;;  %v1151_v19 = vsel %vm1149_vm6, %v519_v39, %v532_v10 }
  0xc4   : > { %v537_v8 = vsel %vm530_vm5, %v533_v58, %v536_v44  ;;  %v1155_v47 = vsel %vm1148_vm4, %v1151_v19, %v1154_v50 }
  0xc5   : > { %v538_v49 = vsel %vm528_vm8, nan, %v537_v8  ;;  %v1156_v57 = vsel %vm528_vm8, nan, %v1155_v47 }
  0xc6   : > { %v1529_v25 = vsub.f32 0.0, %v1156_v57  ;;  %v1593_v26 = vmul.f32 %v2046_v36, %v538_v49  ;;  %v1541_v51 = vsel %vm1521_vm10, 0.0, %v1156_v57 }
  0xc7   : > { %v1605_v33 = vmul.f32 %v1590_v54, %v1541_v51 }
  0xc8   : > { %v1533_v7 = vsel %vm1521_vm10, %v1529_v25, 0.0 }
  0xc9   : > { %v1597_v28 = vmul.f32 %v1576_v35, %v1533_v7 }
  0xcb   : > { %v1601_v63 = vadd.f32 %v1597_v28, %v1593_v26 }
  0xcd   : > { %v1609_v42 = vadd.f32 %v1605_v33, %v1601_v63 }
  0xcf   : > { %1613 = vst [vmem:[%s2483_s29 + $0x8] sm:$0xff] %v1609_v42 }
  0xd0 PF: > { %s12_s11 = sadd.s32 1, %s1826_s11   ;;  %s2525_s9 = smov %s1822_s10 }
  0xd1   : > { %p9_p5 = scmp.ge.s32.totalorder %s12_s11, 4   ;;  %s2526_s10 = smov %s2528_s12 }
  0xd3   :  { %11 = sbr.rel (!%p9_p5) target bundleno = 2 (0x2), region = 65 }

</bundles_post_ra>
